<compile_context>
chip_gen: v7x
topology: tpu7x:2x2x1
jax: 0.10.0
libtpu: 0.0.40
codegen_flags: <defaults>
</compile_context>

<pallas_src>
import jax
import jax.numpy as jnp
from jax.experimental import pallas as pl
from jax.experimental.pallas import tpu as pltpu


def make_contranorm_kernel(scale: float, temp: float, n_tokens: int,
                           fuse_batches: bool, ln_eps: float = 1e-6):
    inv_temp = 1.0 / temp

    def kernel(x_ref, gamma_ref, beta_ref, o_ref):
        x = x_ref[...].astype(jnp.float32)                     # (R, D)
        R = x.shape[0]

        # --- F.normalize(x, dim=2): L2 normalize over the feature axis ---
        # x / max(||x||, 1e-12) == x * rsqrt(max(||x||^2, 1e-24))
        sq = jnp.sum(x * x, axis=-1, keepdims=True)            # (R, 1)
        xn = x * jax.lax.rsqrt(jnp.maximum(sq, 1e-24))         # (R, D)

        # --- sim = xn @ xn^T / temp. Contract D on both operands (no explicit
        #     transpose); bf16 operands feed the MXU, accumulate in f32. ---
        xn_bf = xn.astype(jnp.bfloat16)
        dots = jax.lax.dot_general(
            xn_bf, xn_bf, (((1,), (1,)), ((), ())),
            preferred_element_type=jnp.float32)                # (R, R)

        # --- softmax over rows (dim=2 of the (B,N,N) view), numerator only.
        #     Row max is the diagonal = 1/temp, so subtract the constant
        #     instead of doing an (R,R) cross-lane max reduce. ---
        if temp == 1.0:
            p = jnp.exp(dots - 1.0)                            # (R, R)
        else:
            p = jnp.exp((dots - 1.0) * inv_temp)

        if fuse_batches:
            # Block-diagonal mask: only tokens from the same batch interact.
            # Built from small (R,1)/(1,R) iotas; the compare broadcasts.
            row_b = jax.lax.broadcasted_iota(jnp.int32, (R, 1), 0) // n_tokens
            col_b = jax.lax.broadcasted_iota(jnp.int32, (1, R), 1) // n_tokens
            p = jnp.where(row_b == col_b, p, 0.0)

        # --- x_neg = softmax(sim) @ x. Normalization is deferred past the
        #     matmul: scale the (R,D) result, not the (R,R) probability tile. ---
        rowsum = jnp.sum(p, axis=-1, keepdims=True)            # (R, 1)
        x_neg = jnp.dot(p.astype(jnp.bfloat16), x.astype(jnp.bfloat16),
                        preferred_element_type=jnp.float32)    # (R, D)
        x_neg = x_neg * pl.reciprocal(rowsum, approx=True)     # EUP slot, ~free

        y = x - scale * x_neg

        # --- LayerNorm over D, eps=1e-6; one-pass stats var = E[y^2]-mean^2 ---
        mean = jnp.mean(y, axis=-1, keepdims=True)
        m2 = jnp.mean(y * y, axis=-1, keepdims=True)
        var = jnp.maximum(m2 - mean * mean, 0.0)
        yhat = (y - mean) * jax.lax.rsqrt(var + ln_eps)

        gamma = gamma_ref[...]                                  # (1, D)
        beta = beta_ref[...]                                    # (1, D)
        o_ref[...] = (yhat * gamma + beta).astype(o_ref.dtype)

    return kernel


def _pick_batches_per_step(B: int, N: int, target_rows: int) -> int:
    """Largest legal divisor TB of B with TB*N <= target_rows.

    Legal = row tile is a multiple of 8 or spans the whole array. Prefers
    choices that leave >= 2 grid steps (v7x has 2 TensorCores). Falls back to
    the always-legal full-extent block if nothing else is valid.
    """
    legal = []
    for cand in range(1, B + 1):
        if B % cand != 0:
            continue
        if cand * N > target_rows:
            continue
        if cand != B and (cand * N) % 8 != 0:
            continue
        legal.append(cand)
    if not legal:
        return B                         # full-extent row block is always legal
    multi = [c for c in legal if B // c >= 2]
    return max(multi) if multi else max(legal)


def _vmem_capacity_bytes(default: int = 64 << 20) -> int:
    try:
        return int(pltpu.get_tpu_info().vmem_capacity_bytes)
    except Exception:
        return default                   # conservative (v7x per-TC capacity)


def contranorm(x, gamma, beta, *, scale=0.1, temp=1.0, target_rows=256):
    """x: (B, N, D) float32; gamma, beta: (D,) float32.

    target_rows trades per-step overhead (~0.35 us) against wasted masked
    MXU/EUP work that grows with R; for small N a sweep over {256, 512, 1024}
    is cheap and recommended when tuning on hardware.
    """
    B, N, D = x.shape
    tb = _pick_batches_per_step(B, N, target_rows)
    R = tb * N                                              # rows per grid step
    steps = B // tb

    x2 = x.reshape(B * N, D)
    gamma2 = gamma.reshape(1, D)
    beta2 = beta.reshape(1, D)

    kernel = make_contranorm_kernel(scale, temp, N, fuse_batches=(tb > 1))

    # VMEM budget: double-buffered in/out row slabs + sim temporaries
    # (f32 dots, f32 p, bf16 p) + headroom, capped from the actual chip
    # capacity so a tile validated on 128 MiB parts doesn't spill on v7x.
    blk_bytes = R * D * 4
    sim_bytes = R * R * 4
    estimate = 8 * blk_bytes + 3 * sim_bytes + (4 << 20)
    cap = _vmem_capacity_bytes() - (16 << 20)
    vmem_limit = max(min(estimate, cap), 16 << 20)

    out = pl.pallas_call(
        kernel,
        out_shape=jax.ShapeDtypeStruct((B * N, D), x.dtype),
        grid_spec=pltpu.PrefetchScalarGridSpec(
            num_scalar_prefetch=0,
            grid=(steps,),
            in_specs=[
                pl.BlockSpec((R, D), lambda i: (i, 0)),
                pl.BlockSpec((1, D), lambda i: (0, 0)),
                pl.BlockSpec((1, D), lambda i: (0, 0)),
            ],
            out_specs=pl.BlockSpec((R, D), lambda i: (i, 0)),
        ),
        compiler_params=pltpu.CompilerParams(
            dimension_semantics=("parallel",),
            vmem_limit_bytes=vmem_limit),
    )(x2, gamma2, beta2)

    return out.reshape(B, N, D)


def contranorm_ref(x, gamma, beta, *, scale=0.1, temp=1.0, ln_eps=1e-6):
    """Pure-JAX reference mirroring the PyTorch forward (default flags)."""
    denom = jnp.maximum(jnp.linalg.norm(x, axis=2, keepdims=True), 1e-12)
    xn = x / denom
    sim = jnp.einsum("bnd,bmd->bnm", xn, xn) / temp
    sim = jax.nn.softmax(sim, axis=2)
    x_neg = jnp.einsum("bnm,bmd->bnd", sim, x)
    y = x - scale * x_neg
    mean = jnp.mean(y, axis=-1, keepdims=True)
    var = jnp.mean((y - mean) ** 2, axis=-1, keepdims=True)
    yhat = (y - mean) / jnp.sqrt(var + ln_eps)
    return yhat * gamma + beta


if __name__ == "__main__":
    key = jax.random.PRNGKey(0)
    kx, kg, kb, kx2, kx3 = jax.random.split(key, 5)

    D = 64                      # module default dim
    gamma = 1.0 + 0.01 * jax.random.normal(kg, (D,), dtype=jnp.float32)
    beta = 0.01 * jax.random.normal(kb, (D,), dtype=jnp.float32)

    # Tolerance accounts for bf16 matmul operands (f32 accumulation) and the
    # approximate reciprocal in the softmax normalization.
    ATOL = RTOL = 2e-3

    # Test 1: module-default small shape (batch=2, seq=8, dim=64).
    # Picker keeps 2 grid steps (one batch per slab, no mask path).
    B, N = 2, 8
    x = jax.random.normal(kx, (B, N, D), dtype=jnp.float32)
    out = jax.block_until_ready(contranorm(x, gamma, beta, scale=0.1, temp=1.0))
    ref = contranorm_ref(x, gamma, beta, scale=0.1, temp=1.0)
    assert out.shape == (B, N, D)
    assert jnp.allclose(out, ref, atol=ATOL, rtol=RTOL), float(
        jnp.max(jnp.abs(out - ref)))

    # Test 2: more batches, small target slab -> 2 grid steps with 4 batches
    # fused per slab (exercises the block-diagonal masking path).
    B2, N2 = 8, 8
    x2 = jax.random.normal(kx2, (B2, N2, D), dtype=jnp.float32)
    out2 = jax.block_until_ready(
        contranorm(x2, gamma, beta, scale=0.1, temp=1.0, target_rows=32))
    ref2 = contranorm_ref(x2, gamma, beta, scale=0.1, temp=1.0)
    assert out2.shape == (B2, N2, D)
    assert jnp.allclose(out2, ref2, atol=ATOL, rtol=RTOL), float(
        jnp.max(jnp.abs(out2 - ref2)))

    # Test 3: N not a multiple of 8 -> picker falls back to the full-extent
    # (always legal) row block; mask path with n_tokens=5.
    B3, N3 = 3, 5
    x3 = jax.random.normal(kx3, (B3, N3, D), dtype=jnp.float32)
    out3 = jax.block_until_ready(contranorm(x3, gamma, beta, scale=0.1, temp=1.0))
    ref3 = contranorm_ref(x3, gamma, beta, scale=0.1, temp=1.0)
    assert out3.shape == (B3, N3, D)
    assert jnp.allclose(out3, ref3, atol=ATOL, rtol=RTOL), float(
        jnp.max(jnp.abs(out3 - ref3)))

    print("KERNEL_OK")
</pallas_src>

<mosaic_0001>
module attributes {stable_mosaic.version = 11 : i64} {
  func.func @kernel(%arg0: i32, %arg1: memref<8x64xf32, #tpu.memory_space<vmem>>, %arg2: memref<1x64xf32, #tpu.memory_space<vmem>>, %arg3: memref<1x64xf32, #tpu.memory_space<vmem>>, %arg4: memref<8x64xf32, #tpu.memory_space<vmem>>) attributes {dimension_semantics = [#tpu.dimension_semantics<parallel>], iteration_bounds = array<i64: 2>, scalar_prefetch = 0 : i64, scratch_operands = 0 : i64, tpu.core_type = #tpu.core_type<tc>, window_params = [{transform_indices = @transform_0, window_bounds = array<i64: 8, 64>}, {pipeline_mode = #tpu.pipeline_mode<synchronous>, transform_indices = @transform_1, window_bounds = array<i64: 1, 64>}, {pipeline_mode = #tpu.pipeline_mode<synchronous>, transform_indices = @transform_2, window_bounds = array<i64: 1, 64>}, {transform_indices = @transform_3, window_bounds = array<i64: 8, 64>}]} {
    %c0 = arith.constant 0 : index
    %c0_0 = arith.constant 0 : index
    %0 = vector.load %arg1[%c0, %c0_0] : memref<8x64xf32, #tpu.memory_space<vmem>>, vector<8x64xf32>
    %1 = arith.mulf %0, %0 : vector<8x64xf32>
    %cst = arith.constant dense<0.000000e+00> : vector<8xf32>
    %2 = vector.multi_reduction <add>, %1, %cst [1] : vector<8x64xf32> to vector<8xf32>
    %3 = vector.shape_cast %2 : vector<8xf32> to vector<8x1xf32>
    %cst_1 = arith.constant 1.000000e-24 : f32
    %4 = vector.broadcast %cst_1 : f32 to vector<8x1xf32>
    %5 = arith.maximumf %3, %4 : vector<8x1xf32>
    %6 = math.rsqrt %5 : vector<8x1xf32>
    %7 = vector.broadcast %6 : vector<8x1xf32> to vector<8x64xf32>
    %8 = arith.mulf %0, %7 : vector<8x64xf32>
    %9 = arith.truncf %8 : vector<8x64xf32> to vector<8x64xbf16>
    %cst_2 = arith.constant dense<0.000000e+00> : vector<8x8xf32>
    %10 = tpu.matmul %9, %9, %cst_2 {dimension_numbers = #tpu.dot_dimension_numbers<[1], [1], [0], [0], [0, 0, 1, 0], [], []>} : vector<8x64xbf16>, vector<8x64xbf16>, vector<8x8xf32> -> vector<8x8xf32>
    %cst_3 = arith.constant 1.000000e+00 : f32
    %11 = vector.broadcast %cst_3 : f32 to vector<8x8xf32>
    %12 = arith.subf %10, %11 : vector<8x8xf32>
    %13 = math.exp %12 : vector<8x8xf32>
    %cst_4 = arith.constant dense<0.000000e+00> : vector<8xf32>
    %14 = vector.multi_reduction <add>, %13, %cst_4 [1] : vector<8x8xf32> to vector<8xf32>
    %15 = vector.shape_cast %14 : vector<8xf32> to vector<8x1xf32>
    %16 = arith.truncf %13 : vector<8x8xf32> to vector<8x8xbf16>
    %17 = arith.truncf %0 : vector<8x64xf32> to vector<8x64xbf16>
    %cst_5 = arith.constant dense<0.000000e+00> : vector<8x64xf32>
    %18 = tpu.matmul %16, %17, %cst_5 {dimension_numbers = #tpu.dot_dimension_numbers<[1], [0], [0], [1], [0, 0, 1, 1], [], []>} : vector<8x8xbf16>, vector<8x64xbf16>, vector<8x64xf32> -> vector<8x64xf32>
    %19 = tpu.reciprocal %15 {approx = true} : vector<8x1xf32> -> vector<8x1xf32>
    %20 = vector.broadcast %19 : vector<8x1xf32> to vector<8x64xf32>
    %21 = arith.mulf %18, %20 : vector<8x64xf32>
    %cst_6 = arith.constant 1.000000e-01 : f32
    %22 = vector.broadcast %cst_6 : f32 to vector<8x64xf32>
    %23 = arith.mulf %22, %21 : vector<8x64xf32>
    %24 = arith.subf %0, %23 : vector<8x64xf32>
    %cst_7 = arith.constant dense<0.000000e+00> : vector<8xf32>
    %25 = vector.multi_reduction <add>, %24, %cst_7 [1] : vector<8x64xf32> to vector<8xf32>
    %26 = vector.shape_cast %25 : vector<8xf32> to vector<8x1xf32>
    %cst_8 = arith.constant 6.400000e+01 : f32
    %27 = vector.broadcast %cst_8 : f32 to vector<8x1xf32>
    %28 = arith.divf %26, %27 : vector<8x1xf32>
    %29 = arith.mulf %24, %24 : vector<8x64xf32>
    %cst_9 = arith.constant dense<0.000000e+00> : vector<8xf32>
    %30 = vector.multi_reduction <add>, %29, %cst_9 [1] : vector<8x64xf32> to vector<8xf32>
    %31 = vector.shape_cast %30 : vector<8xf32> to vector<8x1xf32>
    %cst_10 = arith.constant 6.400000e+01 : f32
    %32 = vector.broadcast %cst_10 : f32 to vector<8x1xf32>
    %33 = arith.divf %31, %32 : vector<8x1xf32>
    %34 = arith.mulf %28, %28 : vector<8x1xf32>
    %35 = arith.subf %33, %34 : vector<8x1xf32>
    %cst_11 = arith.constant 0.000000e+00 : f32
    %36 = vector.broadcast %cst_11 : f32 to vector<8x1xf32>
    %37 = arith.maximumf %35, %36 : vector<8x1xf32>
    %38 = vector.broadcast %28 : vector<8x1xf32> to vector<8x64xf32>
    %39 = arith.subf %24, %38 : vector<8x64xf32>
    %cst_12 = arith.constant 9.99999997E-7 : f32
    %40 = vector.broadcast %cst_12 : f32 to vector<8x1xf32>
    %41 = arith.addf %37, %40 : vector<8x1xf32>
    %42 = math.rsqrt %41 : vector<8x1xf32>
    %43 = vector.broadcast %42 : vector<8x1xf32> to vector<8x64xf32>
    %44 = arith.mulf %39, %43 : vector<8x64xf32>
    %c0_13 = arith.constant 0 : index
    %c0_14 = arith.constant 0 : index
    %45 = vector.load %arg2[%c0_13, %c0_14] : memref<1x64xf32, #tpu.memory_space<vmem>>, vector<1x64xf32>
    %c0_15 = arith.constant 0 : index
    %c0_16 = arith.constant 0 : index
    %46 = vector.load %arg3[%c0_15, %c0_16] : memref<1x64xf32, #tpu.memory_space<vmem>>, vector<1x64xf32>
    %47 = vector.broadcast %45 : vector<1x64xf32> to vector<8x64xf32>
    %48 = arith.mulf %44, %47 : vector<8x64xf32>
    %49 = vector.broadcast %46 : vector<1x64xf32> to vector<8x64xf32>
    %50 = arith.addf %48, %49 : vector<8x64xf32>
    %c0_17 = arith.constant 0 : index
    %c0_18 = arith.constant 0 : index
    %51 = vector.load %arg4[%c0_17, %c0_18] : memref<8x64xf32, #tpu.memory_space<vmem>>, vector<8x64xf32>
    tpu.vector_store %arg4[%c0_17, %c0_18], %50 {strides = array<i32>} : memref<8x64xf32, #tpu.memory_space<vmem>>, vector<8x64xf32>,
    return
  }
  func.func @transform_0(%arg0: i32) -> (i32, i32) {
    %c0_i32 = arith.constant 0 : i32
    %c0_i32_0 = arith.constant 0 : i32
    return %arg0, %c0_i32 : i32, i32
  }
  func.func @transform_1(%arg0: i32) -> (i32, i32) {
    %c0_i32 = arith.constant 0 : i32
    %c0_i32_0 = arith.constant 0 : i32
    %c0_i32_1 = arith.constant 0 : i32
    return %c0_i32, %c0_i32_0 : i32, i32
  }
  func.func @transform_2(%arg0: i32) -> (i32, i32) {
    %c0_i32 = arith.constant 0 : i32
    %c0_i32_0 = arith.constant 0 : i32
    %c0_i32_1 = arith.constant 0 : i32
    return %c0_i32, %c0_i32_0 : i32, i32
  }
  func.func @transform_3(%arg0: i32) -> (i32, i32) {
    %c0_i32 = arith.constant 0 : i32
    %c0_i32_0 = arith.constant 0 : i32
    return %arg0, %c0_i32 : i32, i32
  }
}

</mosaic_0001>

<bundles_post_ra>
// kernel: tpu_custom_call.1
= control target key start
LH: loop header
LB: loop body
LE: loop exit
PB: predicated region body
PF: predicated region fallthrough
CT: control target
= control target key end

     0   :  { %8 = vsyncpa [#allocation3], 0  ;;  %s806_s0 = inlined_call_operand.hbm [shape: f32[16,64], index: 0, kind: input, shape index: {}]   ;;  %s807_s1 = inlined_call_operand.vmem [shape: f32[1,64], index: 1, kind: input, shape index: {}]   ;;  %s808_s2 = inlined_call_operand.vmem [shape: f32[1,64], index: 2, kind: input, shape index: {}]   ;;  %s809_s3 = inlined_call_operand.hbm [shape: f32[16,64], index: 3, kind: output, shape index: {}]  }
   0x1   :  { %10 = vsyncpa [#allocation3 + $0x1], 0 }
   0x2   :  { %11 = vsyncpa [#allocation4], 0 }
   0x3   :  { %13 = vsyncpa [#allocation4 + $0x1], 0  ;;  %s629_s12 = smov 0   ;;  %s631_s13 = smov 0  }
   0x4   :  { %s633_s14 = smov 0   ;;  %s635_s15 = smov 0  }
   0x5 LB: > { %s650_s16 = sadd.s32 4294967295, %s603_s15   ;;  %s418_s17 = sadd.s32 4294967294, %s603_s15   ;;  %s603_s15 = sphi %s635_s15, %s824_s15   ;;  %s599_s14 = sphi %s633_s14, %s823_s14   ;;  %s595_s13 = sphi %s631_s13, %s822_s13   ;;  %s591_s12 = sphi %s629_s12, %s821_s12  }
   0x6   : > { %s654_s18 = sadd.s32 1, %s603_s15   ;;  %s26_s19 = sadd.s32 1, %s599_s14 }
   0x7   : > { %s23_s20 = ssub.s32 %s603_s15, %s654_s18  ;;  %p33_p0 = scmp.ne.s32.totalorder %s599_s14, %s595_s13 }
   0x8   : > { %p24_p1 = scmp.eq.s32.totalorder %s23_s20, 0  ;;  %p34_p2 = scmp.eq.s32.totalorder %s603_s15, 0 }
   0x9   : > { %p39_p3 = scmp.ne.s32.totalorder %s595_s13, %s591_s12  ;;  %p40_p4 = scmp.eq.s32.totalorder %s650_s16, 0 }
   0xa   : > { %s666_s21 = scalar_select %p24_p1, %s599_s14, %s26_s19  }
   0xb   : > { %p668_p5 = por %p34_p2, %p33_p0  ;;  %p672_p6 = por %p40_p4, %p39_p3 }
   0xc   : > { %p105_p7 = scmp.eq.s32.totalorder %s650_s16, 1  ;;  %p111_p8 = scmp.eq.s32.totalorder %s418_s17, 1 }
   0xd   : > { %p463_p10 = scmp.lt.s32.totalorder %s603_s15, 2  ;;  %s137_s26 = sand.u32 1, %s599_s14  }
   0xe   : > { %p679_p11 = por %p105_p7, %p33_p0  ;;  %p683_p12 = por %p111_p8, %p39_p3 }
   0xf   : > { %s422_s27 = sshll.u32 %s603_s15, 7  ;;  %s421_s28 = sshll.u32 %s137_s26, 3 }
  0x10   : > { %s813_s24 = scalar_select %p679_p11, 1, 0 }
  0x11   : > { %s814_s25 = scalar_select %p683_p12, 1, 0 }
  0x12   : > { %s692_s4 = scalar_lea.hbm %s806_s0, %s422_s27  ;;  %s141_s5 = scalar_lea.vmem [#allocation2], %s421_s28 }
  0x13   : > { %s148_s6 = sshll.u32 %s141_s5, 4  ;;  %p696_p13 = pnand %p463_p10, %p668_p5  ;;  %s700_s6 = int_to_ptr.vmem [resolvable:$true] %s148_s6 }
  0x14   : > { %s138_s8 = scalar_lea.sflag [#allocation3], %s137_s26  ;;  %s507_s9 = scalar_lea.hbm %s692_s4, 128 }
  0x15   : > { %p508_p2 = scmp.ne.s32.totalorder %s692_s4, %s507_s9  ;;  %p509_p3 = pneg %p696_p13 }
  0x16   : > { %s512_s17 = scalar_lea.hbm %s806_s0, 256  ;;  %p513_p5 = scmp.lt.u32.totalorder %s692_s4, %s806_s0 }
  0x17   : > { %p510_p4 = pnand %p509_p3, %p508_p2  ;;  %p514_p8 = scmp.lt.u32.totalorder %s512_s17, %s507_s9 }
  0x18   : > { %p516_p9 = scmp.lt.u32.totalorder %s507_s9, %s692_s4 }
  0x19   : > { %p511_p7 = pneg %p510_p4  ;;  %p515_p10 = por %p514_p8, %p513_p5 }
  0x1b   : > { %p517_p0 = por %p516_p9, %p515_p10 }
  0x1d   : > { %p518_p1 = pnand %p517_p0, %p511_p7 }
  0x1f   : > { %521 = shalt.err (!%p518_p1)
}
  0x20   : > { %s522_s22 = scalar_lea.vmem %s700_s6, 128  ;;  %s605_s26 = smov [#allocation2]  }
  0x21   : > { %p523_p2 = scmp.ne.s32.totalorder %s700_s6, %s522_s22  ;;  %s527_s27 = sshll.u32 %s605_s26, 4  ;;  %s528_s27 = int_to_ptr.vmem [resolvable:$false] %s527_s27 }
  0x22   : > { %s529_s28 = scalar_lea.vmem %s528_s27, 256  ;;  %p530_p11 = scmp.lt.s32.totalorder %s700_s6, %s528_s27 }
  0x23   : > { %p525_p4 = pnand %p523_p2, %p509_p3  ;;  %p531_p5 = scmp.lt.s32.totalorder %s529_s28, %s522_s22 }
  0x25   : > { %p526_p12 = pneg %p525_p4  ;;  %p532_p8 = por %p531_p5, %p530_p11 }
  0x27   : > { %p533_p9 = pnand %p532_p8, %p526_p12 }
  0x29   : > { %536 = shalt.err (!%p533_p9)
}
  0x2a   : > { %458 = dma.hbm_to_vmem [thread:$0]  (!%p696_p13), %s692_s4, 128, %s700_s6, %s138_s8  }
  0x2b   : > { %p816_p0 = scmp.lt.s32.totalorder %s603_s15, 3  ;;  %p817_p1 = scmp.ge.s32.totalorder %s603_s15, 1 }
  0x2d   : > { %p154_p3 = pnand %p817_p1, %p816_p0 }
  0x2e   : > { %s734_s29 = sand.u32 (!%p154_p3), 1, %s595_s13  }
  0x2f   : > { %157 = sbr.rel (%p154_p3) target bundleno = 859 (0x35b), region = 32  ;;  %s424_s30 = sshll.u32 (!%p154_p3), %s734_s29, 3 }
  0x30   : > { %s160_s5 = scalar_lea.sflag (!%p154_p3), [#allocation3], %s734_s29  ;;  %s163_s7 = scalar_lea.vmem (!%p154_p3), [#allocation2], %s424_s30 }
  0x36   : > { %582 = dma.done.wait (%p672_p6), %s160_s5, 128  }
  0x37   : > { %584 = vsyncadd (%p672_p6), %s160_s5, 4294967168  ;;  %v187_v0 = vld [vmem:[%s163_s7] sm:$0xff]  ;;  %vm189_vm0 = vcmask 523264   ;;  %v606_v3 = vmov 0.0   ;;  %vm607_vm1 = vmmov 0   ;;  %vm252_vm2 = vcmask 1043456  }
  0x38   : > { %v188_v1 = vmul.f32 %v187_v0, %v187_v0  ;;  %439 = vmatprep.subr.bf16.mxu0 %v606_v3  ;;  %445 = vmatprep.subr.bf16.mxu1 %v606_v3  ;;  %v248_v10 = vpack.c.bf16 %v187_v0, %v187_v0  ;;  %vm243_vm3 = vcmask 64512   ;;  %v429_v43 = vld [vmem:[%s807_s1] ss:$0 sm:$0xff]  ;;  %s432_s9 = sshll.u32 %s650_s16, 7  ;;  %s185_s10 = scalar_lea.vmem [#allocation5], %s424_s30 }
  0x39   : > { %441 = vmatprep.mubr.msk.bf16.mxu0 %vm607_vm1, %v606_v3  ;;  %447 = vmatprep.mubr.msk.bf16.mxu1 %vm607_vm1, %v606_v3  ;;  %v430_v45 = vld [vmem:[%s808_s2] ss:$0 sm:$0xff]  ;;  %s348_s11 = sshll.u32 %s185_s10, 4  ;;  %s761_s20 = scalar_lea.hbm %s809_s3, %s432_s9  ;;  %s763_s11 = int_to_ptr.vmem [resolvable:$true] %s348_s11 }
  0x3a   : > { %v190_v2 = vsel %vm189_vm0, %v188_v1, 0.0  ;;  %v254_v11 = vsel %vm252_vm2, %v248_v10, 0  ;;  %s335_s22 = scalar_lea.sflag [#allocation4], %s734_s29  ;;  %s537_s26 = scalar_lea.vmem %s763_s11, 128 }
  0x3b   : > { %191 = vadd.xlane.f32.xlu0 %v190_v2  ;;  %446 = vmatpush3.bf16.msra.mxu1 %v254_v11  ;;  %p538_p6 = scmp.ne.s32.totalorder %s763_s11, %s537_s26  ;;  %p818_p11 = scmp.ne.s32.totalorder %s813_s24, 0 }
  0x3c   : > { %s608_s16 = smov [#allocation5]  }
  0x3d   : > { %p539_p12 = pnand %p538_p6, %p818_p11  ;;  %s541_s27 = sshll.u32 %s608_s16, 4  ;;  %s542_s27 = int_to_ptr.vmem [resolvable:$false] %s541_s27 }
  0x3e   : > { %s543_s28 = scalar_lea.vmem %s542_s27, 256  ;;  %p544_p7 = scmp.lt.s32.totalorder %s763_s11, %s542_s27 }
  0x3f   : > { %p540_p13 = pneg %p539_p12  ;;  %p545_p10 = scmp.lt.s32.totalorder %s543_s28, %s537_s26 }
  0x41   : > { %p546_p2 = por %p545_p10, %p544_p7 }
  0x43   : > { %p547_p4 = pnand %p546_p2, %p540_p13 }
  0xc8   : > { %v192_v4 = vpop.xlane.xlu0 %191 }
  0xc9   : > { %v193_v5 = vmax.f32 %v192_v4, 1e-24 }
  0xcb   : > { %499 = vrsqrt.f32 %v193_v5 }
  0xd5   : > { %v500_v6 = vpop.eup %499 }
  0xd6   : > { %v195_v7 = vmul.f32 %v500_v6, %v187_v0 }
  0xd8   : > { %v196_v8 = vpack.c.bf16 %v195_v7, %v195_v7 }
  0xda   : > { %v198_v9 = vsel %vm189_vm0, %v196_v8, 0 }
  0xdb   : > { %440 = vmatpush3.bf16.xpose.msra.mxu0 %v198_v9 }
  0xe2   : > { %442 = vmatmul.mubr.msk.bf16.vlgmr.msra.gmra.mrb[0].mxu0 %vm189_vm0, %v196_v8 }
 0x1b5   : > { %v234_v12 = vpop.f32.mrb[0].mxu0 }
 0x1b6   : > { %v427_v13 = vadd.f32 -1.0, %v234_v12  ;;  %v443_v14 = vpop.f32.mrb[1].mxu0 }
 0x1b7   : > { %v237_v15 = vpop.f32.mrb[2].mxu0 }
 0x1b8   : > { %v241_v16 = vmul.f32 1.442695, %v427_v13  ;;  %v444_v17 = vpop.f32.mrb[3].mxu0 }
 0x1ba   : > { %501 = vpow2.f32 %v241_v16 }
 0x1c4   : > { %v502_v18 = vpop.eup %501 }
 0x1c5   : > { %v244_v19 = vsel %vm243_vm3, %v502_v18, 0.0  ;;  %v247_v20 = vpack.c.bf16 %v502_v18, %v502_v18 }
 0x1c6   : > { %245 = vadd.xlane.f32.xlu0 %v244_v19 }
 0x1c7   : > { %448 = vmatmul.mubr.msk.bf16.vlgmr.msra.gmra.mrb[0].mxu1 %vm243_vm3, %v247_v20 }
 0x253   : > { %v246_v21 = vpop.xlane.xlu0 %245 }
 0x254   : > { %503 = vrcp.f32 %v246_v21 }
 0x25e   : > { %v504_v22 = vpop.eup %503 }
 0x29a   : > { %v290_v23 = vpop.f32.mrb[0].mxu1 }
 0x29b   : > { %v297_v24 = vmul.f32 %v504_v22, %v290_v23  ;;  %v449_v25 = vpop.f32.mrb[1].mxu1 }
 0x29c   : > { %v293_v26 = vpop.f32.mrb[2].mxu1 }
 0x29d   : > { %v298_v27 = vmul.f32 0.1, %v297_v24  ;;  %v450_v28 = vpop.f32.mrb[3].mxu1 }
 0x29f   : > { %v299_v29 = vsub.f32 %v187_v0, %v298_v27 }
 0x2a1   : > { %v300_v30 = vsel %vm189_vm0, %v299_v29, 0.0  ;;  %v305_v31 = vmul.f32 %v299_v29, %v299_v29 }
 0x2a2   : > { %301 = vadd.xlane.f32.xlu1 %v300_v30 }
 0x2a3   : > { %v306_v32 = vsel %vm189_vm0, %v305_v31, 0.0 }
 0x2a6   : > { %307 = vadd.xlane.f32.xlu1 %v306_v32 }
 0x32f   : > { %v302_v33 = vpop.xlane.xlu1 %301 }
 0x330   : > { %v304_v34 = vmul.f32 0.015625, %v302_v33 }
 0x332   : > { %v310_v36 = vmul.f32 %v304_v34, %v304_v34  ;;  %v313_v41 = vsub.f32 %v299_v29, %v304_v34 }
 0x333   : > { %v308_v35 = vpop.xlane.xlu1 %307 }
 0x334   : > { %v309_v37 = vmul.f32 0.015625, %v308_v35 }
 0x336   : > { %v311_v38 = vsub.f32 %v309_v37, %v310_v36 }
 0x338   : > { %v312_v39 = vmax.f32 %v311_v38, 0.0 }
 0x33a   : > { %v314_v40 = vadd.f32 1e-06, %v312_v39 }
 0x33c   : > { %505 = vrsqrt.f32 %v314_v40 }
 0x346   : > { %v506_v42 = vpop.eup %505 }
 0x347   : > { %v316_v44 = vmul.f32 %v506_v42, %v313_v41 }
 0x349   : > { %v325_v46 = vmul.f32 %v429_v43, %v316_v44 }
 0x34b   : > { %v332_v47 = vadd.f32 %v430_v45, %v325_v46 }
 0x34d   : > { %333 = vst.msk [vmem:[%s185_s10] sm:$0xff] %vm189_vm0, %v332_v47 }
 0x34e   : > { %550 = shalt.err (!%p547_p4)
}
 0x34f   : > { %s551_s29 = scalar_lea.hbm %s761_s20, 128  ;;  %s555_s7 = scalar_lea.hbm %s809_s3, 256 }
 0x350   : > { %p552_p5 = scmp.ne.s32.totalorder %s761_s20, %s551_s29  ;;  %p556_p0 = scmp.lt.u32.totalorder %s761_s20, %s809_s3 }
 0x351   : > { %p557_p1 = scmp.lt.u32.totalorder %s555_s7, %s551_s29  ;;  %p559_p6 = scmp.lt.u32.totalorder %s551_s29, %s761_s20 }
 0x352   : > { %p553_p8 = pnand %p552_p5, %p818_p11 }
 0x353   : > { %p558_p3 = por %p557_p1, %p556_p0 }
 0x354   : > { %p554_p9 = pneg %p553_p8 }
 0x355   : > { %p560_p12 = por %p559_p6, %p558_p3 }
 0x357   : > { %p561_p13 = pnand %p560_p12, %p554_p9 }
 0x359   : > { %564 = shalt.err (!%p561_p13)
}
 0x35a   : > { %453 = dma.vmem_to_hbm [thread:$0]  (%p818_p11), %s763_s11, 128, %s761_s20, %s335_s22  }
 0x35b PF: > { %s360_s6 = sand.u32 1, %s591_s12   ;;  %p819_p7 = scmp.ne.s32.totalorder %s814_s25, 0 }
 0x35c   : > { %p820_p10 = scmp.ge.s32.totalorder %s603_s15, 2  ;;  %s361_s8 = scalar_lea.sflag [#allocation4], %s360_s6 }
 0x35e   : > { %p460_p2 = pnand %p820_p10, %p819_p7 }
 0x360   : > { %586 = dma.done.wait (!%p460_p2), %s361_s8, 128  }
 0x361   : > { %588 = vsyncadd (!%p460_p2), %s361_s8, 4294967168  ;;  %p16_p4 = scmp.ge.s32.totalorder %s654_s18, 4   ;;  %s821_s12 = smov %s595_s13 }
 0x362   : > { %s822_s13 = smov %s599_s14  ;;  %s823_s14 = smov %s666_s21 }
 0x363   : > { %s824_s15 = smov %s654_s18  ;;  %18 = sbr.rel (!%p16_p4) target bundleno = 5 (0x5), region = 77 }
 0x36a   :  { %366 = vsyncpa [#allocation3], 1 }
 0x36b   :  { %368 = vsyncpa [#allocation3 + $0x1], 1 }
 0x36c   :  { %369 = vsyncpa [#allocation4], 1 }
 0x36d   :  { %371 = vsyncpa [#allocation4 + $0x1], 1 }

</bundles_post_ra>
